<compile_context>
chip_gen: v5e
topology: v5e:2x2
jax: 0.10.0
libtpu: 0.0.40
codegen_flags: <defaults>
</compile_context>

<pallas_src>
import jax
import jax.numpy as jnp
from jax.experimental import pallas as pl
from jax.experimental.pallas import tpu as pltpu

# ---------------- configuration (small, consistent with the module) ---------
RES_BLOCKS = 2
IN_DIMS = 16          # mel channels
COMPUTE_DIMS = 32
RES_OUT_DIMS = 16
BATCH = 2
T_IN = 20
K = 5
T_OUT = T_IN - (K - 1)      # valid conv, no padding
EPS = 1e-5
SLAB_LANES = 128            # lane-padded parameter slab width


# ---------------- Pallas kernel ---------------------------------------------
def melresnet_kernel(x_ref, w_ref, b_ref, o_ref):
    """x_ref: (B, Cin, T) f32; w_ref: (rows, 128) bf16 weight slab;
    b_ref: (C, 128) f32 bias slab; o_ref: (R_out, B*T_out) f32 (lane-dense)."""
    batch, cin, _ = x_ref.shape
    n_out = o_ref.shape[1]                  # B * T_out
    t_out = n_out // batch
    C = COMPUTE_DIMS
    R = RES_OUT_DIMS
    KC = K * cin

    # ---- unpack parameter slabs once (static slices; 16-aligned row offs) --
    w_in_T = w_ref[0:C, 0:KC]                                   # (C, K*Cin)
    w_res = []
    for r in range(RES_BLOCKS):
        base = C + 2 * C * r
        w_res.append((w_ref[base:base + C, 0:C],                # w1^T (C, C)
                      w_ref[base + C:base + 2 * C, 0:C]))       # w2^T (C, C)
    ob = C + 2 * C * RES_BLOCKS
    w_out_T = w_ref[ob:ob + R, 0:C]                             # (R, C)

    b_in = b_ref[:, 0:1]                                        # (C, 1)
    b_out = b_ref[0:R, 2 * RES_BLOCKS + 1:2 * RES_BLOCKS + 2]   # (R, 1)

    # ---- in-kernel im2col with batch folded onto lanes ---------------------
    # cols[k*Cin + ci, b*t_out + t] = x[b, ci, t + k]
    xb = [x_ref[b].astype(jnp.bfloat16) for b in range(batch)]  # (Cin, T) each
    cols = jnp.concatenate(
        [jnp.concatenate([xb[b][:, k:k + t_out] for b in range(batch)], axis=1)
         for k in range(K)],
        axis=0)                                                 # (K*Cin, B*T_out)

    # conv_in (k=5, bias=False) + folded BN shift + ReLU — one matmul for all
    # batches.
    h = jnp.dot(w_in_T, cols, preferred_element_type=jnp.float32) + b_in
    h = jnp.maximum(h, 0.0)                                     # (C, B*T_out) f32

    # Residual blocks: 1x1 convs are channel matmuls (BN scales folded).
    for r in range(RES_BLOCKS):
        w1T, w2T = w_res[r]
        b1 = b_ref[:, 1 + 2 * r:2 + 2 * r]                      # (C, 1)
        b2 = b_ref[:, 2 + 2 * r:3 + 2 * r]                      # (C, 1)
        t = jnp.dot(w1T, h.astype(jnp.bfloat16),
                    preferred_element_type=jnp.float32) + b1
        t = jnp.maximum(t, 0.0)
        t = jnp.dot(w2T, t.astype(jnp.bfloat16),
                    preferred_element_type=jnp.float32) + b2
        h = h + t

    # conv_out (k=1, with bias) — single lane-dense store.
    y = jnp.dot(w_out_T, h.astype(jnp.bfloat16),
                preferred_element_type=jnp.float32) + b_out
    o_ref[...] = y.astype(o_ref.dtype)


def melresnet_pallas(x, w_slab, b_slab):
    """x: (B, in_dims, T) f32 NCW like PyTorch. Returns (B, res_out_dims, T_out)."""
    B, Cin, T = x.shape
    t_out = T - (K - 1)
    y = pl.pallas_call(
        melresnet_kernel,
        out_shape=jax.ShapeDtypeStruct((RES_OUT_DIMS, B * t_out), jnp.float32),
        grid_spec=pltpu.PrefetchScalarGridSpec(
            num_scalar_prefetch=0,
            grid=(1,),                      # single step: everything fits VMEM
            in_specs=[
                pl.BlockSpec((B, Cin, T), lambda i: (0, 0, 0)),        # x
                pl.BlockSpec(w_slab.shape, lambda i: (0, 0)),          # weights
                pl.BlockSpec(b_slab.shape, lambda i: (0, 0)),          # biases
            ],
            out_specs=pl.BlockSpec((RES_OUT_DIMS, B * t_out),
                                   lambda i: (0, 0)),
        ),
        compiler_params=pltpu.CompilerParams(
            dimension_semantics=("arbitrary",)),
    )(x, w_slab, b_slab)
    # Kernel output is (R_out, B*T_out) lane-dense; restore PyTorch NCW layout.
    return y.reshape(RES_OUT_DIMS, B, t_out).transpose(1, 0, 2)


# ---------------- deterministic parameters & host-side folding --------------
def make_raw_params(key):
    """'PyTorch-like' raw parameters (conv weights + eval-mode BN stats)."""
    ks = iter(jax.random.split(key, 64))
    nrm = lambda shape, s=0.1: (s * jax.random.normal(next(ks), shape)).astype(jnp.float32)
    uni = lambda shape: jax.random.uniform(next(ks), shape,
                                           minval=0.8, maxval=1.25).astype(jnp.float32)
    bn = lambda c: (uni((c,)), nrm((c,)), nrm((c,)), uni((c,)))  # gamma,beta,mean,var
    return {
        "w_in": nrm((COMPUTE_DIMS, IN_DIMS, K)),                 # (C, Cin, K)
        "bn_in": bn(COMPUTE_DIMS),
        "w1": [nrm((COMPUTE_DIMS, COMPUTE_DIMS, 1)) for _ in range(RES_BLOCKS)],
        "w2": [nrm((COMPUTE_DIMS, COMPUTE_DIMS, 1)) for _ in range(RES_BLOCKS)],
        "bn1": [bn(COMPUTE_DIMS) for _ in range(RES_BLOCKS)],
        "bn2": [bn(COMPUTE_DIMS) for _ in range(RES_BLOCKS)],
        "w_out": nrm((RES_OUT_DIMS, COMPUTE_DIMS, 1)),
        "b_out": nrm((RES_OUT_DIMS,)),
    }


def fold_bn(gamma, beta, mean, var):
    scale = gamma / jnp.sqrt(var + EPS)
    return scale, beta - mean * scale


def fold_and_pack(raw):
    """Fold eval-mode BN scales into weights; pack into 2 lane-padded slabs."""
    C, R, KC = COMPUTE_DIMS, RES_OUT_DIMS, K * IN_DIMS

    s_in, b_in = fold_bn(*raw["bn_in"])
    # (C, Cin, K) -> (C, K, Cin) -> (C, K*Cin); column order k*Cin + ci matches
    # the in-kernel im2col (concat over k of channel blocks).
    w_in_T = ((raw["w_in"] * s_in[:, None, None])
              .transpose(0, 2, 1).reshape(C, KC)).astype(jnp.bfloat16)

    w1T, w2T, b1, b2 = [], [], [], []
    for r in range(RES_BLOCKS):
        s1, sh1 = fold_bn(*raw["bn1"][r])
        s2, sh2 = fold_bn(*raw["bn2"][r])
        w1T.append((raw["w1"][r][:, :, 0] * s1[:, None]).astype(jnp.bfloat16))
        w2T.append((raw["w2"][r][:, :, 0] * s2[:, None]).astype(jnp.bfloat16))
        b1.append(sh1)
        b2.append(sh2)

    w_out_T = raw["w_out"][:, :, 0].astype(jnp.bfloat16)        # (R, C)
    b_out = raw["b_out"]

    folded = dict(w_in_T=w_in_T, w1T=w1T, w2T=w2T, b1=b1, b2=b2,
                  w_out_T=w_out_T, b_in=b_in, b_out=b_out)

    # One bf16 weight slab padded to 128 lanes,
    # rows = [w_in_T, w1T_0, w2T_0, w1T_1, w2T_1, w_out_T] (16-aligned offsets).
    pad_l = lambda w: jnp.pad(w, ((0, 0), (0, SLAB_LANES - w.shape[1])))
    rows = [pad_l(w_in_T)]
    for r in range(RES_BLOCKS):
        rows += [pad_l(w1T[r]), pad_l(w2T[r])]
    rows.append(pad_l(w_out_T))
    w_slab = jnp.concatenate(rows, axis=0)            # (C+4C+R, 128) bf16

    # One f32 bias slab padded to 128 columns,
    # columns = [b_in, b1_0, b2_0, b1_1, b2_1, b_out(padded), 0...].
    cols = [b_in]
    for r in range(RES_BLOCKS):
        cols += [b1[r], b2[r]]
    cols.append(jnp.pad(b_out, (0, C - R)))
    b_small = jnp.stack(cols, axis=1).astype(jnp.float32)        # (C, 2*Rb+2)
    b_slab = jnp.pad(b_small, ((0, 0), (0, SLAB_LANES - b_small.shape[1])))

    return folded, w_slab, b_slab


# ---------------- references (for correctness checks) -----------------------
def melresnet_ref_bf16(x, folded):
    """Mirrors the kernel math exactly (folded weights, bf16 matmul operands,
    batch folded onto the lane axis)."""
    B, _, T = x.shape
    t_out = T - (K - 1)
    cols = jnp.concatenate(
        [jnp.concatenate([x[b, :, k:k + t_out] for b in range(B)], axis=1)
         for k in range(K)],
        axis=0).astype(jnp.bfloat16)                             # (K*Cin, B*T_out)
    h = jnp.dot(folded["w_in_T"], cols,
                preferred_element_type=jnp.float32) + folded["b_in"][:, None]
    h = jnp.maximum(h, 0.0)
    for r in range(RES_BLOCKS):
        t = jnp.dot(folded["w1T"][r], h.astype(jnp.bfloat16),
                    preferred_element_type=jnp.float32) + folded["b1"][r][:, None]
        t = jnp.maximum(t, 0.0)
        t = jnp.dot(folded["w2T"][r], t.astype(jnp.bfloat16),
                    preferred_element_type=jnp.float32) + folded["b2"][r][:, None]
        h = h + t
    y = jnp.dot(folded["w_out_T"], h.astype(jnp.bfloat16),
                preferred_element_type=jnp.float32) + folded["b_out"][:, None]
    return y.reshape(RES_OUT_DIMS, B, t_out).transpose(1, 0, 2)


def melresnet_ref_f32(x, raw):
    """Module-style full-f32 reference (conv -> eval BN -> relu -> resblocks)."""
    B, _, T = x.shape
    t_out = T - (K - 1)

    def bn(h, p):
        g, b, m, v = p
        s = g / jnp.sqrt(v + EPS)
        return (h - m[None, :, None]) * s[None, :, None] + b[None, :, None]

    h = jnp.zeros((B, COMPUTE_DIMS, t_out), jnp.float32)
    for k in range(K):
        h = h + jnp.einsum("oi,bit->bot", raw["w_in"][:, :, k],
                           x[:, :, k:k + t_out])
    h = jnp.maximum(bn(h, raw["bn_in"]), 0.0)
    for r in range(RES_BLOCKS):
        t = jnp.einsum("oc,bct->bot", raw["w1"][r][:, :, 0], h)
        t = jnp.maximum(bn(t, raw["bn1"][r]), 0.0)
        t = jnp.einsum("oc,bct->bot", raw["w2"][r][:, :, 0], t)
        t = bn(t, raw["bn2"][r])
        h = h + t
    return (jnp.einsum("oc,bct->bot", raw["w_out"][:, :, 0], h)
            + raw["b_out"][None, :, None])


# ---------------- main -------------------------------------------------------
if __name__ == "__main__":
    key = jax.random.PRNGKey(0)
    kx, kp = jax.random.split(key)
    x = jax.random.normal(kx, (BATCH, IN_DIMS, T_IN), dtype=jnp.float32)

    raw = make_raw_params(kp)
    folded, w_slab, b_slab = fold_and_pack(raw)

    out = jax.jit(melresnet_pallas)(x, w_slab, b_slab)
    out = jax.block_until_ready(out)
    assert out.shape == (BATCH, RES_OUT_DIMS, T_OUT), out.shape

    # Tight check against a jnp reference that mirrors the kernel math exactly.
    ref_q = melresnet_ref_bf16(x, folded)
    assert jnp.allclose(out, ref_q, rtol=2e-3, atol=2e-3), (
        float(jnp.max(jnp.abs(out - ref_q))))

    # Loose sanity check against the full-f32 module semantics
    # (difference is only the bf16 quantization of the matmul operands).
    ref_f = melresnet_ref_f32(x, raw)
    assert float(jnp.max(jnp.abs(out - ref_f))) < 1e-1, (
        float(jnp.max(jnp.abs(out - ref_f))))

    print("KERNEL_OK")
</pallas_src>

<mosaic_0001>
module attributes {stable_mosaic.version = 11 : i64} {
  func.func @melresnet_kernel(%arg0: i32, %arg1: memref<2x16x20xf32, #tpu.memory_space<vmem>>, %arg2: memref<176x128xbf16, #tpu.memory_space<vmem>>, %arg3: memref<32x128xf32, #tpu.memory_space<vmem>>, %arg4: memref<16x32xf32, #tpu.memory_space<vmem>>) attributes {dimension_semantics = [#tpu.dimension_semantics<arbitrary>], iteration_bounds = array<i64: 1>, scalar_prefetch = 0 : i64, scratch_operands = 0 : i64, tpu.core_type = #tpu.core_type<tc>, window_params = [{pipeline_mode = #tpu.pipeline_mode<synchronous>, transform_indices = @transform_0, window_bounds = array<i64: 2, 16, 20>}, {pipeline_mode = #tpu.pipeline_mode<synchronous>, transform_indices = @transform_1, window_bounds = array<i64: 176, 128>}, {pipeline_mode = #tpu.pipeline_mode<synchronous>, transform_indices = @transform_2, window_bounds = array<i64: 32, 128>}, {pipeline_mode = #tpu.pipeline_mode<synchronous>, transform_indices = @transform_3, window_bounds = array<i64: 16, 32>}]} {
    %c0 = arith.constant 0 : index
    %c0_0 = arith.constant 0 : index
    %0 = vector.load %arg2[%c0, %c0_0] : memref<176x128xbf16, #tpu.memory_space<vmem>>, vector<32x80xbf16>
    %c32 = arith.constant 32 : index
    %c0_1 = arith.constant 0 : index
    %1 = vector.load %arg2[%c32, %c0_1] : memref<176x128xbf16, #tpu.memory_space<vmem>>, vector<32x32xbf16>
    %c64 = arith.constant 64 : index
    %c0_2 = arith.constant 0 : index
    %2 = vector.load %arg2[%c64, %c0_2] : memref<176x128xbf16, #tpu.memory_space<vmem>>, vector<32x32xbf16>
    %c96 = arith.constant 96 : index
    %c0_3 = arith.constant 0 : index
    %3 = vector.load %arg2[%c96, %c0_3] : memref<176x128xbf16, #tpu.memory_space<vmem>>, vector<32x32xbf16>
    %c128 = arith.constant 128 : index
    %c0_4 = arith.constant 0 : index
    %4 = vector.load %arg2[%c128, %c0_4] : memref<176x128xbf16, #tpu.memory_space<vmem>>, vector<32x32xbf16>
    %c160 = arith.constant 160 : index
    %c0_5 = arith.constant 0 : index
    %5 = vector.load %arg2[%c160, %c0_5] : memref<176x128xbf16, #tpu.memory_space<vmem>>, vector<16x32xbf16>
    %c0_6 = arith.constant 0 : index
    %c0_7 = arith.constant 0 : index
    %6 = vector.load %arg3[%c0_6, %c0_7] : memref<32x128xf32, #tpu.memory_space<vmem>>, vector<32x1xf32>
    %c0_8 = arith.constant 0 : index
    %c5 = arith.constant 5 : index
    %7 = vector.load %arg3[%c0_8, %c5] : memref<32x128xf32, #tpu.memory_space<vmem>>, vector<16x1xf32>
    %c0_9 = arith.constant 0 : index
    %c0_10 = arith.constant 0 : index
    %c0_11 = arith.constant 0 : index
    %8 = vector.load %arg1[%c0_9, %c0_10, %c0_11] : memref<2x16x20xf32, #tpu.memory_space<vmem>>, vector<1x16x20xf32>
    %9 = vector.shape_cast %8 : vector<1x16x20xf32> to vector<16x20xf32>
    %10 = arith.truncf %9 : vector<16x20xf32> to vector<16x20xbf16>
    %c1 = arith.constant 1 : index
    %c0_12 = arith.constant 0 : index
    %c0_13 = arith.constant 0 : index
    %11 = vector.load %arg1[%c1, %c0_12, %c0_13] : memref<2x16x20xf32, #tpu.memory_space<vmem>>, vector<1x16x20xf32>
    %12 = vector.shape_cast %11 : vector<1x16x20xf32> to vector<16x20xf32>
    %13 = arith.truncf %12 : vector<16x20xf32> to vector<16x20xbf16>
    %14 = vector.extract_strided_slice %10 {offsets = [0, 0], sizes = [16, 16], strides = [1, 1]} : vector<16x20xbf16> to vector<16x16xbf16>
    %15 = vector.extract_strided_slice %13 {offsets = [0, 0], sizes = [16, 16], strides = [1, 1]} : vector<16x20xbf16> to vector<16x16xbf16>
    %16 = tpu.concatenate %14, %15 in 1 : vector<16x16xbf16>, vector<16x16xbf16> -> vector<16x32xbf16>
    %17 = vector.extract_strided_slice %10 {offsets = [0, 1], sizes = [16, 16], strides = [1, 1]} : vector<16x20xbf16> to vector<16x16xbf16>
    %18 = vector.extract_strided_slice %13 {offsets = [0, 1], sizes = [16, 16], strides = [1, 1]} : vector<16x20xbf16> to vector<16x16xbf16>
    %19 = tpu.concatenate %17, %18 in 1 : vector<16x16xbf16>, vector<16x16xbf16> -> vector<16x32xbf16>
    %20 = vector.extract_strided_slice %10 {offsets = [0, 2], sizes = [16, 16], strides = [1, 1]} : vector<16x20xbf16> to vector<16x16xbf16>
    %21 = vector.extract_strided_slice %13 {offsets = [0, 2], sizes = [16, 16], strides = [1, 1]} : vector<16x20xbf16> to vector<16x16xbf16>
    %22 = tpu.concatenate %20, %21 in 1 : vector<16x16xbf16>, vector<16x16xbf16> -> vector<16x32xbf16>
    %23 = vector.extract_strided_slice %10 {offsets = [0, 3], sizes = [16, 16], strides = [1, 1]} : vector<16x20xbf16> to vector<16x16xbf16>
    %24 = vector.extract_strided_slice %13 {offsets = [0, 3], sizes = [16, 16], strides = [1, 1]} : vector<16x20xbf16> to vector<16x16xbf16>
    %25 = tpu.concatenate %23, %24 in 1 : vector<16x16xbf16>, vector<16x16xbf16> -> vector<16x32xbf16>
    %26 = vector.extract_strided_slice %10 {offsets = [0, 4], sizes = [16, 16], strides = [1, 1]} : vector<16x20xbf16> to vector<16x16xbf16>
    %27 = vector.extract_strided_slice %13 {offsets = [0, 4], sizes = [16, 16], strides = [1, 1]} : vector<16x20xbf16> to vector<16x16xbf16>
    %28 = tpu.concatenate %26, %27 in 1 : vector<16x16xbf16>, vector<16x16xbf16> -> vector<16x32xbf16>
    %29 = tpu.concatenate %16, %19, %22, %25, %28 in 0 : vector<16x32xbf16>, vector<16x32xbf16>, vector<16x32xbf16>, vector<16x32xbf16>, vector<16x32xbf16> -> vector<80x32xbf16>
    %cst = arith.constant dense<0.000000e+00> : vector<32x32xf32>
    %30 = tpu.matmul %0, %29, %cst {dimension_numbers = #tpu.dot_dimension_numbers<[1], [0], [0], [1], [0, 0, 1, 1], [], []>} : vector<32x80xbf16>, vector<80x32xbf16>, vector<32x32xf32> -> vector<32x32xf32>
    %31 = vector.broadcast %6 : vector<32x1xf32> to vector<32x32xf32>
    %32 = arith.addf %30, %31 : vector<32x32xf32>
    %cst_14 = arith.constant 0.000000e+00 : f32
    %33 = vector.broadcast %cst_14 : f32 to vector<32x32xf32>
    %34 = arith.maximumf %32, %33 : vector<32x32xf32>
    %c0_15 = arith.constant 0 : index
    %c1_16 = arith.constant 1 : index
    %35 = vector.load %arg3[%c0_15, %c1_16] : memref<32x128xf32, #tpu.memory_space<vmem>>, vector<32x1xf32>
    %c0_17 = arith.constant 0 : index
    %c2 = arith.constant 2 : index
    %36 = vector.load %arg3[%c0_17, %c2] : memref<32x128xf32, #tpu.memory_space<vmem>>, vector<32x1xf32>
    %37 = arith.truncf %34 : vector<32x32xf32> to vector<32x32xbf16>
    %cst_18 = arith.constant dense<0.000000e+00> : vector<32x32xf32>
    %38 = tpu.matmul %1, %37, %cst_18 {dimension_numbers = #tpu.dot_dimension_numbers<[1], [0], [0], [1], [0, 0, 1, 1], [], []>} : vector<32x32xbf16>, vector<32x32xbf16>, vector<32x32xf32> -> vector<32x32xf32>
    %39 = vector.broadcast %35 : vector<32x1xf32> to vector<32x32xf32>
    %40 = arith.addf %38, %39 : vector<32x32xf32>
    %cst_19 = arith.constant 0.000000e+00 : f32
    %41 = vector.broadcast %cst_19 : f32 to vector<32x32xf32>
    %42 = arith.maximumf %40, %41 : vector<32x32xf32>
    %43 = arith.truncf %42 : vector<32x32xf32> to vector<32x32xbf16>
    %cst_20 = arith.constant dense<0.000000e+00> : vector<32x32xf32>
    %44 = tpu.matmul %2, %43, %cst_20 {dimension_numbers = #tpu.dot_dimension_numbers<[1], [0], [0], [1], [0, 0, 1, 1], [], []>} : vector<32x32xbf16>, vector<32x32xbf16>, vector<32x32xf32> -> vector<32x32xf32>
    %45 = vector.broadcast %36 : vector<32x1xf32> to vector<32x32xf32>
    %46 = arith.addf %44, %45 : vector<32x32xf32>
    %47 = arith.addf %34, %46 : vector<32x32xf32>
    %c0_21 = arith.constant 0 : index
    %c3 = arith.constant 3 : index
    %48 = vector.load %arg3[%c0_21, %c3] : memref<32x128xf32, #tpu.memory_space<vmem>>, vector<32x1xf32>
    %c0_22 = arith.constant 0 : index
    %c4 = arith.constant 4 : index
    %49 = vector.load %arg3[%c0_22, %c4] : memref<32x128xf32, #tpu.memory_space<vmem>>, vector<32x1xf32>
    %50 = arith.truncf %47 : vector<32x32xf32> to vector<32x32xbf16>
    %cst_23 = arith.constant dense<0.000000e+00> : vector<32x32xf32>
    %51 = tpu.matmul %3, %50, %cst_23 {dimension_numbers = #tpu.dot_dimension_numbers<[1], [0], [0], [1], [0, 0, 1, 1], [], []>} : vector<32x32xbf16>, vector<32x32xbf16>, vector<32x32xf32> -> vector<32x32xf32>
    %52 = vector.broadcast %48 : vector<32x1xf32> to vector<32x32xf32>
    %53 = arith.addf %51, %52 : vector<32x32xf32>
    %cst_24 = arith.constant 0.000000e+00 : f32
    %54 = vector.broadcast %cst_24 : f32 to vector<32x32xf32>
    %55 = arith.maximumf %53, %54 : vector<32x32xf32>
    %56 = arith.truncf %55 : vector<32x32xf32> to vector<32x32xbf16>
    %cst_25 = arith.constant dense<0.000000e+00> : vector<32x32xf32>
    %57 = tpu.matmul %4, %56, %cst_25 {dimension_numbers = #tpu.dot_dimension_numbers<[1], [0], [0], [1], [0, 0, 1, 1], [], []>} : vector<32x32xbf16>, vector<32x32xbf16>, vector<32x32xf32> -> vector<32x32xf32>
    %58 = vector.broadcast %49 : vector<32x1xf32> to vector<32x32xf32>
    %59 = arith.addf %57, %58 : vector<32x32xf32>
    %60 = arith.addf %47, %59 : vector<32x32xf32>
    %61 = arith.truncf %60 : vector<32x32xf32> to vector<32x32xbf16>
    %cst_26 = arith.constant dense<0.000000e+00> : vector<16x32xf32>
    %62 = tpu.matmul %5, %61, %cst_26 {dimension_numbers = #tpu.dot_dimension_numbers<[1], [0], [0], [1], [0, 0, 1, 1], [], []>} : vector<16x32xbf16>, vector<32x32xbf16>, vector<16x32xf32> -> vector<16x32xf32>
    %63 = vector.broadcast %7 : vector<16x1xf32> to vector<16x32xf32>
    %64 = arith.addf %62, %63 : vector<16x32xf32>
    %c0_27 = arith.constant 0 : index
    %c0_28 = arith.constant 0 : index
    %65 = vector.load %arg4[%c0_27, %c0_28] : memref<16x32xf32, #tpu.memory_space<vmem>>, vector<16x32xf32>
    tpu.vector_store %arg4[%c0_27, %c0_28], %64 {strides = array<i32>} : memref<16x32xf32, #tpu.memory_space<vmem>>, vector<16x32xf32>,
    return
  }
  func.func @transform_0(%arg0: i32) -> (i32, i32, i32) {
    %c0_i32 = arith.constant 0 : i32
    %c0_i32_0 = arith.constant 0 : i32
    %c0_i32_1 = arith.constant 0 : i32
    %c0_i32_2 = arith.constant 0 : i32
    return %c0_i32, %c0_i32_0, %c0_i32_1 : i32, i32, i32
  }
  func.func @transform_1(%arg0: i32) -> (i32, i32) {
    %c0_i32 = arith.constant 0 : i32
    %c0_i32_0 = arith.constant 0 : i32
    %c0_i32_1 = arith.constant 0 : i32
    return %c0_i32, %c0_i32_0 : i32, i32
  }
  func.func @transform_2(%arg0: i32) -> (i32, i32) {
    %c0_i32 = arith.constant 0 : i32
    %c0_i32_0 = arith.constant 0 : i32
    %c0_i32_1 = arith.constant 0 : i32
    return %c0_i32, %c0_i32_0 : i32, i32
  }
  func.func @transform_3(%arg0: i32) -> (i32, i32) {
    %c0_i32 = arith.constant 0 : i32
    %c0_i32_0 = arith.constant 0 : i32
    %c0_i32_1 = arith.constant 0 : i32
    return %c0_i32, %c0_i32_0 : i32, i32
  }
}

</mosaic_0001>

<bundles_post_ra>
// kernel: melresnet_pallas.1
= control target key start
LH: loop header
LB: loop body
LE: loop exit
PB: predicated region body
PF: predicated region fallthrough
CT: control target
= control target key end

     0   :  { %8 = vsyncpa [#allocation3], 0  ;;  %s792_s0 = inlined_call_operand.hbm [shape: f32[2,16,20], index: 0, kind: input, shape index: {}]   ;;  %s793_s1 = inlined_call_operand.hbm [shape: bf16[176,128], index: 1, kind: input, shape index: {}]   ;;  %s794_s2 = inlined_call_operand.hbm [shape: f32[32,128], index: 2, kind: input, shape index: {}]   ;;  %s795_s3 = inlined_call_operand.vmem [shape: f32[16,32], index: 3, kind: output, shape index: {}]  }
   0x1   :  { %9 = vsyncpa [#allocation5], 0  ;;  %s27_s14 = sshll.u32 %s793_s1, 4  ;;  %s661_s15 = smov [#allocation4]   ;;  %s28_s14 = int_to_ptr.hbm [resolvable:$true] %s27_s14 }
   0x2   :  { %s29_s16 = sshll.u32 %s661_s15, 4  ;;  %s14_s19 = sshll.u32 %s792_s0, 4  ;;  %s30_s16 = int_to_ptr.vmem [resolvable:$true] %s29_s16  ;;  %s15_s19 = int_to_ptr.hbm [resolvable:$true] %s14_s19 }
   0x3   :  { %s662_s20 = smov 64   ;;  %s663_s21 = smov 4  }
   0x4   :  { %35 = dma.hbm_to_vmem [thread:$0]  %s28_s14, 1408, %s30_s16, [#allocation5], %s662_s20, %s662_s20, %s663_s21  }
   0x5   :  { %s664_s22 = smov [#allocation2]   ;;  %s665_s24 = smov 128  }
   0x6   :  { %s16_s23 = sshll.u32 %s664_s22, 4  ;;  %s666_s25 = smov 8   ;;  %s17_s23 = int_to_ptr.vmem [resolvable:$true] %s16_s23 }
   0x7   :  { %22 = dma.hbm_to_vmem [thread:$0]  %s15_s19, 512, %s17_s23, [#allocation3], %s665_s24, %s665_s24, %s666_s25  }
   0x8   :  { %s40_s27 = sshll.u32 %s794_s2, 4  ;;  %s667_s28 = smov [#allocation6]   ;;  %s41_s27 = int_to_ptr.hbm [resolvable:$true] %s40_s27 }
   0x9   :  { %s42_s29 = sshll.u32 %s667_s28, 4  ;;  %s43_s29 = int_to_ptr.vmem [resolvable:$true] %s42_s29 }
   0xa   :  { %48 = dma.hbm_to_vmem [thread:$0]  %s41_s27, 512, %s43_s29, [#allocation5], %s665_s24, %s665_s24, %s666_s25  }
   0xb   :  { %657 = dma.done.wait [#allocation3], 512  }
   0xc   :  { %658 = vsyncadd [#allocation3], 4294966784 }
   0xd   :  { %659 = dma.done.wait [#allocation5], 1920  }
   0xe   :  { %660 = vsyncadd [#allocation5], 4294965376  ;;  %v90_v0 = vld [vmem:[#allocation2] sm:$0xff]  ;;  %v91_v1 = vld [vmem:[#allocation2 + $0x8] sm:$0xff]  ;;  %s668_s0 = smov 125   ;;  %s669_s2 = smov 124  }
   0xf   :  { %v95_v2 = vld [vmem:[#allocation2 + $0x10] sm:$0xff]  ;;  %v92_v3 = vpack.c.bf16 %v90_v0, %v90_v0  ;;  %v93_v4 = vpack.c.bf16 %v91_v1, %v91_v1  ;;  %v96_v5 = vld [vmem:[#allocation2 + $0x18] sm:$0xff]  ;;  %s670_s30 = smov 126   ;;  %s671_s4 = smov 13   ;;  %v677_v15 = vmov 0   ;;  %vm111_vm0 = vcmask 130048  }
  0x10   :  { %v97_v8 = vpack.c.bf16 %v95_v2, %v95_v2  ;;  %v98_v9 = vpack.c.bf16 %v96_v5, %v96_v5  ;;  %s672_s5 = smov 12   ;;  %s673_s6 = smov 14   ;;  %v712_v14 = vld [vmem:[#allocation6 + $0x18] sm:$0xff]  ;;  %570 = vset.pattern.permute.xlu1 %v677_v15  ;;  %569 = vset.pattern.permute.xlu0 %v677_v15  ;;  %v717_v24 = vld [vmem:[#allocation6 + $0x8] sm:$0xff]  ;;  %v719_v25 = vld [vmem:[#allocation6 + $0x10] sm:$0xff]  ;;  %vm178_vm1 = vcmask 654336  }
  0x11   :  { %v101_v6 = vunpack.c.l.b16 %v92_v3  ;;  %v102_v7 = vunpack.c.l.b16 %v93_v4  ;;  %s674_s7 = smov 15   ;;  %s675_s8 = smov 127   ;;  %571 = vset.pattern.permute.xlu2 %v677_v15  ;;  %v721_v26 = vld [vmem:[#allocation6] sm:$0xff]  ;;  %v534_v33 = vld [vmem:[#allocation4] sm:$0xff]  ;;  %v535_v34 = vld [vmem:[#allocation4 + $0x8] sm:$0xff]  ;;  %v678_v36 = vmov 1  }
  0x12   :  { %v106_v11 = vunpack.c.l.b16 %v97_v8  ;;  %v107_v12 = vunpack.c.l.b16 %v98_v9  ;;  %s676_s9 = smov 16   ;;  %v537_v54 = vld [vmem:[#allocation4 + $0x18] sm:$0xff]  ;;  %v536_v55 = vld [vmem:[#allocation4 + $0x10] sm:$0xff]  ;;  %vm236_vm2 = vcmask 261120   ;;  %v679_v56 = vmov 2  }
  0x13   :  { %v103_v10 = vpack.c.b16 %v102_v7, %v101_v6 }
  0x14   :  { %v108_v13 = vpack.c.b16 %v107_v12, %v106_v11  ;;  %v538_v11 = vld [vmem:[#allocation4 + $0x20] sm:$0xff]  ;;  %v539_v12 = vld [vmem:[#allocation4 + $0x28] sm:$0xff] }
  0x15   :  { %132 = vrot.lane.b32.xlu1 %v103_v10, %s668_s0  ;;  %140 = vrot.lane.b32.xlu0 %v103_v10, %s669_s2 }
  0x16   :  { %124 = vrot.lane.b32.xlu2 %v103_v10, %s670_s30 }
  0x1d   :  { %134 = vrot.lane.b32.xlu1 %v108_v13, %s671_s4  ;;  %142 = vrot.lane.b32.xlu0 %v108_v13, %s672_s5 }
  0x1e   :  { %126 = vrot.lane.b32.xlu2 %v108_v13, %s673_s6 }
  0x25   :  { %118 = vrot.lane.b32.xlu1 %v108_v13, %s674_s7  ;;  %116 = vrot.lane.b32.xlu0 %v103_v10, %s675_s8 }
  0x26   :  { %109 = vrot.lane.b32.xlu2 %v108_v13, %s676_s9 }
  0x2d   :  { %165 = vperm.xlu1 %570, %v712_v14   ;;  %160 = vperm.xlu0 %569, %v719_v25  }
  0x2e   :  { %150 = vperm.xlu2 %571, %v721_v26  }
  0x35   :  { %155 = vperm.xlu1 %570, %v717_v24   ;;  %573 = vset.pattern.permute.xlu0 %v678_v36 }
  0x36   :  { %223 = vperm.xlu0 %573, %v712_v14   ;;  %572 = vset.pattern.permute.xlu2 %v678_v36 }
  0x37   :  { %219 = vperm.xlu2 %572, %v719_v25  }
  0x3d   :  { %574 = vset.pattern.permute.xlu1 %v678_v36  ;;  %v540_v36 = vld [vmem:[#allocation4 + $0x30] sm:$0xff] }
  0x3e   :  { %211 = vperm.xlu1 %574, %v721_v26   ;;  %577 = vset.pattern.permute.xlu0 %v679_v56 }
  0x3f   :  { %215 = vperm.xlu2 %572, %v717_v24   ;;  %269 = vperm.xlu0 %577, %v721_v26  }
  0x46   :  { %575 = vset.pattern.permute.xlu1 %v679_v56 }
  0x47   :  { %277 = vperm.xlu1 %575, %v719_v25   ;;  %576 = vset.pattern.permute.xlu2 %v679_v56  ;;  %v543_v56 = vld [vmem:[#allocation4 + $0x48] sm:$0xff] }
  0x48   :  { %281 = vperm.xlu2 %576, %v712_v14  }
  0x4f   :  { %273 = vperm.xlu1 %575, %v717_v24  }
  0x70   :  { %v125_v18 = vpop.permute.xlu2 %124 }
  0x78   :  { %v127_v22 = vpop.permute.xlu2 %126 }
  0x79   :  { %v130_v29 = vsel %vm111_vm0, %v125_v18, %v127_v22 }
  0x80   :  { %v110_v31 = vpop.permute.xlu2 %109 }
  0x81   :  { %v114_v32 = vsel %vm111_vm0, %v103_v10, %v110_v31 }
  0x87   :  { %v133_v16 = vpop.permute.xlu1 %132  ;;  %v141_v17 = vpop.permute.xlu0 %140 }
  0x88   :  { %v151_v43 = vpop.permute.xlu2 %150 }
  0x8f   :  { %v135_v19 = vpop.permute.xlu1 %134  ;;  %v143_v20 = vpop.permute.xlu0 %142 }
  0x90   :  { %v146_v21 = vsel %vm111_vm0, %v141_v17, %v143_v20  ;;  %v138_v23 = vsel %vm111_vm0, %v133_v16, %v135_v19 }
  0x91   :  { %188 = vmatpush.bf16.msra.mxu0 %v146_v21  ;;  %v220_v57 = vpop.permute.xlu2 %219  ;;  %v680_v21 = vmov 3  }
  0x92   :  { %580 = vset.pattern.permute.xlu0 %v680_v21  ;;  %578 = vset.pattern.permute.xlu2 %v680_v21 }
  0x93   :  { %330 = vperm.xlu0 %580, %v717_v24   ;;  %334 = vperm.xlu2 %578, %v719_v25  }
  0x94   :  { %579 = vset.pattern.permute.xlu1 %v680_v21 }
  0x95   :  { %189 = vmatpush.bf16.msra.mxu0 %v138_v23  ;;  %338 = vperm.xlu1 %579, %v712_v14  }
  0x97   :  { %v119_v27 = vpop.permute.xlu1 %118  ;;  %v117_v28 = vpop.permute.xlu0 %116 }
  0x98   :  { %v122_v30 = vsel %vm111_vm0, %v117_v28, %v119_v27 }
  0x99   :  { %190 = vmatpush.bf16.msra.mxu0 %v130_v29  ;;  %v216_v61 = vpop.permute.xlu2 %215 }
  0x9b   :  { %326 = vperm.xlu2 %578, %v721_v26  }
  0x9d   :  { %191 = vmatpush.bf16.msra.mxu0 %v122_v30 }
  0x9f   :  { %v166_v38 = vpop.permute.xlu1 %165  ;;  %v161_v40 = vpop.permute.xlu0 %160 }
  0xa1   :  { %192 = vmatpush.bf16.msra.mxu0 %v114_v32 }
  0xa2   :  { %v282_v19 = vpop.permute.xlu2 %281 }
  0xa4   :  { %487 = vmatmul.msk.bf16.vlgmr.msra.gmra.mxu0 %vm178_vm1, %v534_v33 }
  0xa7   :  { %v156_v41 = vpop.permute.xlu1 %155 }
  0xa8   :  { %v224_v63 = vpop.permute.xlu0 %223 }
  0xb0   :  { %v212_v60 = vpop.permute.xlu1 %211 }
  0xb1   :  { %v270_v22 = vpop.permute.xlu0 %269 }
  0xb4   :  { %488 = vmatmul.msk.bf16.gmra.mxu0 %vm178_vm1, %v535_v34 }
  0xb9   :  { %v278_v16 = vpop.permute.xlu1 %277 }
  0xc1   :  { %v274_v18 = vpop.permute.xlu1 %273 }
 0x121   :  { %v194_v35 = vpop.f32.mrf.mxu0 }
 0x122   :  { %v739_v47 = vadd.f32 %v194_v35, %v151_v43  ;;  %v331_v43 = vpop.permute.xlu0 %330 }
 0x124   :  { %v204_v52 = vmax.f32 %v739_v47, 0.0 }
 0x129   :  { %v196_v37 = vpop.f32.mrf.mxu0 }
 0x12a   :  { %v735_v45 = vadd.f32 %v196_v37, %v156_v41  ;;  %v541_v37 = vld [vmem:[#allocation4 + $0x38] sm:$0xff]  ;;  %v335_v41 = vpop.permute.xlu2 %334 }
 0x12c   :  { %v205_v50 = vmax.f32 %v735_v45, 0.0 }
 0x12e   :  { %v208_v53 = vpack.c.bf16 %v205_v50, %v204_v52 }
 0x131   :  { %v199_v39 = vpop.f32.mrf.mxu0 }
 0x132   :  { %v733_v42 = vadd.f32 %v199_v39, %v161_v40  ;;  %v681_v39 = vmov 4  }
 0x133   :  { %581 = vset.pattern.permute.xlu1 %v681_v39  ;;  %582 = vset.pattern.permute.xlu2 %v681_v39 }
 0x134   :  { %v206_v48 = vmax.f32 %v733_v42, 0.0  ;;  %391 = vperm.xlu1 %581, %v719_v25   ;;  %395 = vperm.xlu2 %582, %v712_v14  }
 0x139   :  { %v201_v44 = vpop.f32.mrf.mxu0 }
 0x13a   :  { %v737_v46 = vadd.f32 %v201_v44, %v166_v38  ;;  %v339_v44 = vpop.permute.xlu1 %338 }
 0x13c   :  { %v207_v49 = vmax.f32 %v737_v46, 0.0  ;;  %383 = vperm.xlu1 %581, %v721_v26   ;;  %387 = vperm.xlu2 %582, %v717_v24   ;;  %v327_v46 = vpop.permute.xlu2 %326 }
 0x13e   :  { %v209_v51 = vpack.c.bf16 %v207_v49, %v206_v48 }
 0x140   :  { %249 = vmatpush.bf16.msra.mxu1 %v209_v51  ;;  %545 = vmatpush.bf16.msra.mxu3 %v209_v51 }
 0x144   :  { %250 = vmatpush.bf16.msra.mxu1 %v208_v53  ;;  %546 = vmatpush.bf16.msra.mxu3 %v208_v53 }
 0x147   :  { %498 = vmatmul.msk.bf16.vlgmr.msra.gmra.mxu3 %vm236_vm2, %v537_v54  ;;  %497 = vmatmul.msk.bf16.vlgmr.msra.gmra.mxu1 %vm236_vm2, %v536_v55  ;;  %v542_v55 = vld [vmem:[#allocation4 + $0x40] sm:$0xff] }
 0x1c4   :  { %v252_v58 = vpop.f32.mrf.mxu1 }
 0x1c5   :  { %v253_v2 = vadd.f32 %v252_v58, %v212_v60  ;;  %v682_v58 = vmov 5   ;;  %v396_v60 = vpop.permute.xlu2 %395 }
 0x1c6   :  { %583 = vset.pattern.permute.xlu0 %v682_v58  ;;  %584 = vset.pattern.permute.xlu1 %v682_v58 }
 0x1c7   :  { %v262_v7 = vmax.f32 %v253_v2, 0.0  ;;  %441 = vperm.xlu0 %583, %v721_v26   ;;  %446 = vperm.xlu1 %584, %v717_v24   ;;  %v544_v26 = vld [vmem:[#allocation4 + $0x50] sm:$0xff] }
 0x1ca   :  { %v257_v59 = vpop.f32.mrf.mxu3 }
 0x1cb   :  { %v258_v0 = vadd.f32 %v257_v59, %v220_v57 }
 0x1cc   :  { %v254_v62 = vpop.f32.mrf.mxu1 }
 0x1cd   :  { %v255_v3 = vadd.f32 %v254_v62, %v216_v61  ;;  %v264_v5 = vmax.f32 %v258_v0, 0.0  ;;  %v392_v61 = vpop.permute.xlu1 %391 }
 0x1cf   :  { %v263_v8 = vmax.f32 %v255_v3, 0.0 }
 0x1d1   :  { %v266_v10 = vpack.c.bf16 %v263_v8, %v262_v7 }
 0x1d2   :  { %v259_v1 = vpop.f32.mrf.mxu3 }
 0x1d3   :  { %v260_v4 = vadd.f32 %v259_v1, %v224_v63  ;;  %v388_v63 = vpop.permute.xlu2 %387 }
 0x1d5   :  { %v265_v6 = vmax.f32 %v260_v4, 0.0  ;;  %v384_v1 = vpop.permute.xlu1 %383 }
 0x1d7   :  { %v267_v9 = vpack.c.bf16 %v265_v6, %v264_v5 }
 0x1d9   :  { %306 = vmatpush.bf16.msra.mxu2 %v267_v9 }
 0x1dd   :  { %307 = vmatpush.bf16.msra.mxu2 %v266_v10 }
 0x1e0   :  { %507 = vmatmul.msk.bf16.vlgmr.msra.gmra.mxu2 %vm236_vm2, %v538_v11 }
 0x1f0   :  { %508 = vmatmul.msk.bf16.gmra.mxu2 %vm236_vm2, %v539_v12 }
 0x239   :  { %v442_v24 = vpop.permute.xlu0 %441 }
 0x263   :  { %v309_v13 = vpop.f32.mrf.mxu2 }
 0x264   :  { %v310_v29 = vadd.f32 %v309_v13, %v270_v22 }
 0x266   :  { %v319_v34 = vadd.f32 %v310_v29, %v204_v52 }
 0x26b   :  { %v311_v15 = vpop.f32.mrf.mxu2 }
 0x26c   :  { %v312_v27 = vadd.f32 %v311_v15, %v274_v18  ;;  %v447_v15 = vpop.permute.xlu1 %446 }
 0x26e   :  { %v320_v32 = vadd.f32 %v312_v27, %v205_v50 }
 0x270   :  { %v323_v35 = vpack.c.bf16 %v320_v32, %v319_v34 }
 0x273   :  { %v314_v17 = vpop.f32.mrf.mxu2 }
 0x274   :  { %v315_v20 = vadd.f32 %v314_v17, %v278_v16 }
 0x276   :  { %v321_v30 = vadd.f32 %v315_v20, %v206_v48 }
 0x27b   :  { %v316_v23 = vpop.f32.mrf.mxu2 }
 0x27c   :  { %v317_v28 = vadd.f32 %v316_v23, %v282_v19 }
 0x27e   :  { %v322_v31 = vadd.f32 %v317_v28, %v207_v49 }
 0x280   :  { %v324_v33 = vpack.c.bf16 %v322_v31, %v321_v30 }
 0x282   :  { %363 = vmatpush.bf16.msrb.mxu3 %v324_v33 }
 0x286   :  { %364 = vmatpush.bf16.msrb.mxu3 %v323_v35 }
 0x289   :  { %517 = vmatmul.msk.bf16.vlgmr.msrb.gmra.mxu3 %vm236_vm2, %v540_v36 }
 0x299   :  { %518 = vmatmul.msk.bf16.gmra.mxu3 %vm236_vm2, %v541_v37 }
 0x30c   :  { %v366_v38 = vpop.f32.mrf.mxu3 }
 0x30d   :  { %v367_v50 = vadd.f32 %v366_v38, %v327_v46 }
 0x30f   :  { %v376_v54 = vmax.f32 %v367_v50, 0.0 }
 0x314   :  { %v368_v40 = vpop.f32.mrf.mxu3 }
 0x315   :  { %v369_v48 = vadd.f32 %v368_v40, %v331_v43 }
 0x317   :  { %v377_v53 = vmax.f32 %v369_v48, 0.0 }
 0x319   :  { %v380_v14 = vpack.c.bf16 %v377_v53, %v376_v54 }
 0x31c   :  { %v371_v42 = vpop.f32.mrf.mxu3 }
 0x31d   :  { %v372_v45 = vadd.f32 %v371_v42, %v335_v41 }
 0x31f   :  { %v378_v51 = vmax.f32 %v372_v45, 0.0 }
 0x324   :  { %v373_v47 = vpop.f32.mrf.mxu3 }
 0x325   :  { %v374_v49 = vadd.f32 %v373_v47, %v339_v44 }
 0x327   :  { %v379_v52 = vmax.f32 %v374_v49, 0.0 }
 0x329   :  { %v381_v25 = vpack.c.bf16 %v379_v52, %v378_v51 }
 0x32b   :  { %420 = vmatpush.bf16.msrb.mxu1 %v381_v25 }
 0x32f   :  { %421 = vmatpush.bf16.msrb.mxu1 %v380_v14 }
 0x332   :  { %527 = vmatmul.msk.bf16.vlgmr.msrb.gmra.mxu1 %vm236_vm2, %v542_v55 }
 0x342   :  { %528 = vmatmul.msk.bf16.gmra.mxu1 %vm236_vm2, %v543_v56 }
 0x3af   :  { %v423_v57 = vpop.f32.mrf.mxu1 }
 0x3b0   :  { %v424_v5 = vadd.f32 %v423_v57, %v384_v1 }
 0x3b2   :  { %v433_v10 = vadd.f32 %v424_v5, %v319_v34 }
 0x3b7   :  { %v425_v59 = vpop.f32.mrf.mxu1 }
 0x3b8   :  { %v426_v3 = vadd.f32 %v425_v59, %v388_v63 }
 0x3ba   :  { %v434_v8 = vadd.f32 %v426_v3, %v320_v32 }
 0x3bc   :  { %v437_v11 = vpack.c.bf16 %v434_v8, %v433_v10 }
 0x3bf   :  { %v428_v62 = vpop.f32.mrf.mxu1 }
 0x3c0   :  { %v429_v0 = vadd.f32 %v428_v62, %v392_v61 }
 0x3c2   :  { %v435_v6 = vadd.f32 %v429_v0, %v321_v30 }
 0x3c7   :  { %v430_v2 = vpop.f32.mrf.mxu1 }
 0x3c8   :  { %v431_v4 = vadd.f32 %v430_v2, %v396_v60 }
 0x3ca   :  { %v436_v7 = vadd.f32 %v431_v4, %v322_v31 }
 0x3cc   :  { %v438_v9 = vpack.c.bf16 %v436_v7, %v435_v6 }
 0x3ce   :  { %463 = vmatpush.bf16.msrb.mxu2 %v438_v9 }
 0x3d2   :  { %464 = vmatpush.bf16.msrb.mxu2 %v437_v11 }
 0x3d5   :  { %533 = vmatmul.msk.bf16.vlgmr.msrb.gmra.mxu2 %vm236_vm2, %v544_v26 }
 0x458   :  { %v466_v12 = vpop.f32.mrf.mxu2 }
 0x459   :  { %v467_v13 = vadd.f32 %v466_v12, %v442_v24 }
 0x45b   :  { %471 = vst.msk [vmem:[%s795_s3] sm:$0xff] %vm236_vm2, %v467_v13 }
 0x460   :  { %v468_v16 = vpop.f32.mrf.mxu2 }
 0x461   :  { %v469_v17 = vadd.f32 %v468_v16, %v447_v15 }
 0x463   :  { %472 = vst.msk [vmem:[%s795_s3 + $0x8] sm:$0xff] %vm236_vm2, %v469_v17 }
 0x464   :  { %477 = vsyncpa [#allocation3], 1 }
 0x465   :  { %478 = vsyncpa [#allocation5], 1 }

</bundles_post_ra>
